<compile_context>
chip_gen: v6e
topology: v6e:2x2x1
jax: 0.10.0
libtpu: 0.0.40
codegen_flags: <defaults>
</compile_context>

<pallas_src>
import functools
import math

import jax
import jax.numpy as jnp
from jax.experimental import pallas as pl
from jax.experimental.pallas import tpu as pltpu


def _meanpool_kernel(x_ref, *rest, use_mlp, has_mask):
    # x_ref : (TB, G, D)   member embeddings for TB batch rows
    # m_ref : (TB, G)      mask (-inf absent / 0 present)        [only if has_mask]
    # w_ref : (D, O)       Linear weight, transposed             [only if use_mlp]
    # b_ref : (1, O)       Linear bias                           [only if use_mlp]
    # o_ref : (TB, Dout)
    refs = list(rest)
    m_ref = refs.pop(0) if has_mask else None
    if use_mlp:
        w_ref = refs.pop(0)
        b_ref = refs.pop(0)
    o_ref = refs.pop(0)

    tb, g, d = x_ref.shape
    x = x_ref[...]                                              # (TB, G, D), input dtype

    if use_mlp:
        o = w_ref.shape[1]
        # One MXU matmul for the whole tile: (TB*G, D) @ (D, O) with f32 accumulation.
        h = jnp.dot(x.reshape(tb * g, d), w_ref[...],
                    preferred_element_type=jnp.float32)          # (TB*G, O)
        h = h + b_ref[...].astype(jnp.float32)
        h = jnp.maximum(h, 0.0)                                  # ReLU
        # TODO(synk): nn.Dropout(drop_ratio=0) is identity in eval mode; omitted.
        h = jnp.tanh(h)                                          # torch.tanh(self.mlp(x))
        h = h.reshape(tb, g, o)                                  # (TB, G, O) f32
    else:
        h = x.astype(jnp.float32)                                # (TB, G, D) f32

    if has_mask:
        wts = jnp.exp(m_ref[...].astype(jnp.float32))            # (TB, G) f32
        num = jnp.sum(h * wts[:, :, None], axis=1)               # (TB, Dout) f32
        den = jnp.sum(wts, axis=1, keepdims=True)                # (TB, 1)  f32
        inv = pl.reciprocal(den, approx=False)                   # one reciprocal per row
        o_ref[...] = (num * inv).astype(o_ref.dtype)
    else:
        # torch.mean(h, dim=1)
        o_ref[...] = (jnp.sum(h, axis=1) * (1.0 / g)).astype(o_ref.dtype)


def _choose_tb(B, G, D, out_dim, itemsize, mlp):
    """Largest batch-tile that keeps the working set comfortably in scoped VMEM."""
    row_bytes = G * D * itemsize                 # x tile row (double-buffered by Pallas)
    if mlp:
        row_bytes += 2 * G * out_dim * 4         # f32 activations + one fused temp
    row_bytes += out_dim * 4                     # output row
    budget = 3 << 20                             # ~3 MiB of per-row state per tile
    tb = budget // max(1, row_bytes)
    tb = max(8, min(1024, (tb // 8) * 8))
    # Single tile covering the full batch (also handles B < 8 / B not a multiple of 8:
    # block dim == full array dim always satisfies the layout constraint).
    return B if B <= tb else tb


def mean_pool_aggregator(x, mask, weight, bias, *, mlp=False):
    """x: [B, G, D]; mask: [B, G] (-inf/0) or None; weight: [O, D]; bias: [O]."""
    B, G, D = x.shape
    O = weight.shape[0]
    out_dim = O if mlp else D
    has_mask = mask is not None

    TB = _choose_tb(B, G, D, out_dim, x.dtype.itemsize, mlp)
    grid = (pl.cdiv(B, TB),)

    in_specs = [pl.BlockSpec((TB, G, D), lambda i: (i, 0, 0))]   # x slab
    args = [x]
    if has_mask:
        in_specs.append(pl.BlockSpec((TB, G), lambda i: (i, 0)))  # lane-dense 2-D mask
        args.append(mask.astype(jnp.float32))
    if mlp:
        in_specs.append(pl.BlockSpec((D, O), lambda i: (0, 0)))   # W^T (resident)
        in_specs.append(pl.BlockSpec((1, O), lambda i: (0, 0)))   # bias (resident)
        args.append(jnp.transpose(weight))                        # [D, O]
        args.append(bias.reshape(1, O))

    kernel = functools.partial(_meanpool_kernel, use_mlp=mlp, has_mask=has_mask)

    out = pl.pallas_call(
        kernel,
        out_shape=jax.ShapeDtypeStruct((B, out_dim), x.dtype),
        grid_spec=pltpu.PrefetchScalarGridSpec(
            num_scalar_prefetch=0,
            grid=grid,
            in_specs=in_specs,
            out_specs=pl.BlockSpec((TB, out_dim), lambda i: (i, 0)),
        ),
        compiler_params=pltpu.CompilerParams(
            dimension_semantics=("parallel",)),                   # lets v7x use both TCs
    )(*args)
    return out


def _reference(x, mask, weight, bias, *, mlp=False):
    """Pure-JAX replica of the PyTorch forward, for verification."""
    if mlp:
        h = jnp.tanh(jax.nn.relu(jnp.einsum("bgd,od->bgo", x, weight) + bias))
    else:
        h = x
    if mask is None:
        return jnp.mean(h, axis=1)
    w = jnp.exp(mask)
    return jnp.sum(h * w[:, :, None], axis=1) / jnp.sum(w, axis=1, keepdims=True)


if __name__ == "__main__":
    # Small shapes consistent with the module: B groups of up to G members, dim D.
    B, G, D, O = 2, 8, 32, 32

    key = jax.random.PRNGKey(0)
    kx, km, kw = jax.random.split(key, 3)

    x = jax.random.normal(kx, (B, G, D), dtype=jnp.float32)

    # mask: 0 for present members, -inf for absent members.
    present = jax.random.bernoulli(km, 0.75, (B, G))
    present = present.at[:, 0].set(True)  # ensure at least one member per group
    mask = jnp.where(present, 0.0, -jnp.inf).astype(jnp.float32)

    # Deterministic xavier_uniform init for the Linear weight [O, D]; bias = 0.
    bound = math.sqrt(6.0 / (D + O))
    weight = jax.random.uniform(kw, (O, D), dtype=jnp.float32,
                                minval=-bound, maxval=bound)
    bias = jnp.zeros((O,), dtype=jnp.float32)

    # Run the forward variants through the Pallas kernel.
    out_plain = mean_pool_aggregator(x, mask, weight, bias, mlp=False)
    out_mlp = mean_pool_aggregator(x, mask, weight, bias, mlp=True)
    out_nomask = mean_pool_aggregator(x, None, weight, bias, mlp=True)
    jax.block_until_ready((out_plain, out_mlp, out_nomask))

    ref_plain = _reference(x, mask, weight, bias, mlp=False)
    ref_mlp = _reference(x, mask, weight, bias, mlp=True)
    ref_nomask = _reference(x, None, weight, bias, mlp=True)

    assert out_plain.shape == (B, D) and out_mlp.shape == (B, O)
    assert jnp.allclose(out_plain, ref_plain, atol=1e-5, rtol=1e-5)
    assert jnp.allclose(out_mlp, ref_mlp, atol=1e-5, rtol=1e-5)
    assert jnp.allclose(out_nomask, ref_nomask, atol=1e-5, rtol=1e-5)

    print("KERNEL_OK")
</pallas_src>

<mosaic_0001>
module attributes {stable_mosaic.version = 11 : i64} {
  func.func @_meanpool_kernel(%arg0: i32, %arg1: memref<2x8x32xf32, #tpu.memory_space<vmem>>, %arg2: memref<2x8xf32, #tpu.memory_space<vmem>>, %arg3: memref<2x32xf32, #tpu.memory_space<vmem>>) attributes {dimension_semantics = [#tpu.dimension_semantics<parallel>], iteration_bounds = array<i64: 1>, scalar_prefetch = 0 : i64, scratch_operands = 0 : i64, tpu.core_type = #tpu.core_type<tc>, window_params = [{transform_indices = @transform_0, window_bounds = array<i64: 2, 8, 32>}, {transform_indices = @transform_1, window_bounds = array<i64: 2, 8>}, {transform_indices = @transform_2, window_bounds = array<i64: 2, 32>}]} {
    %c0 = arith.constant 0 : index
    %c0_0 = arith.constant 0 : index
    %c0_1 = arith.constant 0 : index
    %0 = vector.load %arg1[%c0, %c0_0, %c0_1] : memref<2x8x32xf32, #tpu.memory_space<vmem>>, vector<2x8x32xf32>
    %c0_2 = arith.constant 0 : index
    %c0_3 = arith.constant 0 : index
    %1 = vector.load %arg2[%c0_2, %c0_3] : memref<2x8xf32, #tpu.memory_space<vmem>>, vector<2x8xf32>
    %2 = math.exp %1 : vector<2x8xf32>
    %3 = vector.shape_cast %2 : vector<2x8xf32> to vector<2x8x1xf32>
    %4 = vector.broadcast %3 : vector<2x8x1xf32> to vector<2x8x32xf32>
    %5 = arith.mulf %0, %4 : vector<2x8x32xf32>
    %cst = arith.constant dense<0.000000e+00> : vector<2x32xf32>
    %6 = vector.multi_reduction <add>, %5, %cst [1] : vector<2x8x32xf32> to vector<2x32xf32>
    %cst_4 = arith.constant dense<0.000000e+00> : vector<2xf32>
    %7 = vector.multi_reduction <add>, %2, %cst_4 [1] : vector<2x8xf32> to vector<2xf32>
    %8 = vector.shape_cast %7 : vector<2xf32> to vector<2x1xf32>
    %9 = tpu.reciprocal %8 : vector<2x1xf32> -> vector<2x1xf32>
    %10 = vector.broadcast %9 : vector<2x1xf32> to vector<2x32xf32>
    %11 = arith.mulf %6, %10 : vector<2x32xf32>
    %c0_5 = arith.constant 0 : index
    %c0_6 = arith.constant 0 : index
    %12 = vector.load %arg3[%c0_5, %c0_6] : memref<2x32xf32, #tpu.memory_space<vmem>>, vector<2x32xf32>
    tpu.vector_store %arg3[%c0_5, %c0_6], %11 {strides = array<i32>} : memref<2x32xf32, #tpu.memory_space<vmem>>, vector<2x32xf32>,
    return
  }
  func.func @transform_0(%arg0: i32) -> (i32, i32, i32) {
    %c0_i32 = arith.constant 0 : i32
    %c0_i32_0 = arith.constant 0 : i32
    %c0_i32_1 = arith.constant 0 : i32
    return %arg0, %c0_i32, %c0_i32_0 : i32, i32, i32
  }
  func.func @transform_1(%arg0: i32) -> (i32, i32) {
    %c0_i32 = arith.constant 0 : i32
    %c0_i32_0 = arith.constant 0 : i32
    return %arg0, %c0_i32 : i32, i32
  }
  func.func @transform_2(%arg0: i32) -> (i32, i32) {
    %c0_i32 = arith.constant 0 : i32
    %c0_i32_0 = arith.constant 0 : i32
    return %arg0, %c0_i32 : i32, i32
  }
}

</mosaic_0001>

<bundles_post_ra>
// kernel: tpu_custom_call.1
= control target key start
LH: loop header
LB: loop body
LE: loop exit
PB: predicated region body
PF: predicated region fallthrough
CT: control target
= control target key end

     0   :  { %7 = vsyncpa [#allocation3], 0  ;;  %s213_s0 = inlined_call_operand.hbm [shape: f32[2,8,32], index: 0, kind: input, shape index: {}]   ;;  %s214_s1 = inlined_call_operand.hbm [shape: f32[2,8], index: 1, kind: input, shape index: {}]   ;;  %s215_s2 = inlined_call_operand.hbm [shape: f32[2,32], index: 2, kind: output, shape index: {}]  }
   0x1   :  { %8 = vsyncpa [#allocation6], 0 }
   0x2   :  { %9 = vsyncpa [#allocation4], 0  ;;  %s184_s9 = smov [#allocation2]  }
   0x3   :  { %s15_s10 = sshll.u32 %s184_s9, 4  ;;  %s16_s10 = int_to_ptr.vmem [resolvable:$true] %s15_s10 }
   0x4   :  { %s126_s11 = scalar_lea.vmem %s16_s10, 256  ;;  %p131_p1 = scmp.lt.s32.totalorder %s16_s10, %s16_s10 }
   0x5   :  { %p127_p0 = scmp.ne.s32.totalorder %s16_s10, %s126_s11  ;;  %p132_p2 = scmp.lt.s32.totalorder %s126_s11, %s126_s11 }
   0x7   :  { %p133_p3 = por %p132_p2, %p131_p1 }
   0x9   :  { %p134_p4 = pnand %p133_p3, %p127_p0 }
   0xb   :  { %137 = shalt.err (!%p134_p4)
}
   0xc   :  { %s185_s12 = smov 128   ;;  %s186_s13 = smov 8  }
   0xd   :  { %21 = dma.hbm_to_vmem [thread:$0]  %s213_s0, 256, %s16_s10, [#allocation3], %s185_s12, %s185_s12, %s186_s13  }
   0xe   :  { %s187_s16 = smov [#allocation5]  }
   0xf   :  { %s28_s17 = sshll.u32 %s187_s16, 4  ;;  %s29_s17 = int_to_ptr.vmem [resolvable:$true] %s28_s17 }
  0x10   :  { %s146_s18 = scalar_lea.vmem %s29_s17, 32  ;;  %p151_p6 = scmp.lt.s32.totalorder %s29_s17, %s29_s17 }
  0x11   :  { %p147_p5 = scmp.ne.s32.totalorder %s29_s17, %s146_s18  ;;  %p152_p7 = scmp.lt.s32.totalorder %s146_s18, %s146_s18 }
  0x13   :  { %p153_p8 = por %p152_p7, %p151_p6 }
  0x15   :  { %p154_p9 = pnand %p153_p8, %p147_p5 }
  0x17   :  { %157 = shalt.err (!%p154_p9)
}
  0x18   :  { %31 = dma.hbm_to_vmem [thread:$0]  %s214_s1, 32, %s29_s17, [#allocation6]  }
  0x19   :  { %178 = dma.done.wait [#allocation3], 256  }
  0x1a   :  { %179 = vsyncadd [#allocation3], 4294967040 }
  0x1b   :  { %180 = dma.done.wait [#allocation6], 32  }
  0x1c   :  { %181 = vsyncadd [#allocation6], 4294967264  ;;  %v40_v0 = vld [vmem:[#allocation5] sm:$0x3]  ;;  %v43_v2 = vlaneseq  ;;  %vm74_vm0 = vcmask 58368   ;;  %v38_v11 = vld [vmem:[#allocation2] sm:$0xff] }
  0x1d   :  { %v41_v1 = vmul.f32 1.442695, %v40_v0  ;;  %vm59_vm1 = vcmask 261120   ;;  %v39_v17 = vld [vmem:[#allocation2 + $0x8] sm:$0xff]  ;;  %s188_s0 = smov [#allocation7]   ;;  %vm88_vm2 = vcmask 1041409  }
  0x1e   :  { %v44_v3 = vshrl.u32 %v43_v2, 7  ;;  %s99_s1 = sshll.u32 %s188_s0, 4  ;;  %vm91_vm3 = vcmask 254976   ;;  %s100_s1 = int_to_ptr.vmem [resolvable:$true] %s99_s1 }
  0x1f   :  { %114 = vpow2.f32 %v41_v1  ;;  %s158_s21 = scalar_lea.vmem %s100_s1, 32  ;;  %p163_p11 = scmp.lt.s32.totalorder %s100_s1, %s100_s1 }
  0x20   :  { %v45_v4 = vsub.s32 0, %v44_v3  ;;  %v52_v8 = vsub.s32 1, %v44_v3  ;;  %p159_p10 = scmp.ne.s32.totalorder %s100_s1, %s158_s21  ;;  %p164_p12 = scmp.lt.s32.totalorder %s158_s21, %s158_s21 }
  0x22   :  { %p165_p13 = por %p164_p12, %p163_p11 }
  0x24   :  { %p166_p0 = pnand %p165_p13, %p159_p10 }
  0x2c   :  { %v115_v5 = vpop.eup %114 }
  0x2d   :  { %v75_v6 = vsel %vm74_vm0, %v115_v5, 0.0  ;;  %v46_v7 = vrot.slane %v115_v5, %v45_v4  ;;  %v53_v9 = vrot.slane %v115_v5, %v52_v8 }
  0x2e   :  { %76 = vadd.xlane.f32.xlu0 %v75_v6 }
  0x2f   :  { %48 = vbcast.lane.b32.xlu1 %v46_v7, 256 }
  0x44   :  { %55 = vbcast.lane.b32.xlu0 %v53_v9, 256 }
  0xa1   :  { %v49_v10 = vpop.permute.xlu1 %48 }
  0xa2   :  { %v57_v12 = vmul.f32 %v49_v10, %v38_v11 }
  0xa4   :  { %v60_v13 = vsel %vm59_vm1, %v57_v12, 0.0 }
  0xa5   :  { %v61_v14 = vrot.slane %v60_v13, 4 }
  0xa7   :  { %v62_v16 = vadd.f32 %v61_v14, %v60_v13 }
  0xa9   :  { %v63_v20 = vrot.slane %v62_v16, 2 }
  0xab   :  { %v64_v23 = vadd.f32 %v63_v20, %v62_v16 }
  0xad   :  { %v65_v26 = vrot.slane %v64_v23, 1 }
  0xaf   :  { %v66_v30 = vadd.f32 %v65_v26, %v64_v23 }
  0xb7   :  { %v77_v15 = vpop.xlane.xlu0 %76 }
  0xb8   :  { %116 = vrcp.f32 %v77_v15 }
  0xbb   :  { %v56_v18 = vpop.permute.xlu0 %55 }
  0xbc   :  { %v58_v19 = vmul.f32 %v56_v18, %v39_v17 }
  0xbe   :  { %v67_v21 = vsel %vm59_vm1, %v58_v19, 0.0 }
  0xbf   :  { %v68_v22 = vrot.slane %v67_v21, 4 }
  0xc1   :  { %v69_v24 = vadd.f32 %v68_v22, %v67_v21 }
  0xc3   :  { %v70_v25 = vrot.slane %v69_v24, 2 }
  0xc5   :  { %v71_v27 = vadd.f32 %v70_v25, %v69_v24  ;;  %v117_v28 = vpop.eup %116 }
  0xc6   :  { %v80_v32 = vrot.slane %v117_v28, 1  ;;  %v83_v34 = vmul.f32 %v117_v28, %v66_v30 }
  0xc7   :  { %v72_v29 = vrot.slane %v71_v27, 1 }
  0xc9   :  { %v73_v31 = vadd.f32 %v72_v29, %v71_v27 }
  0xcb   :  { %v84_v33 = vmul.f32 %v80_v32, %v73_v31 }
  0xcd   :  { %v87_v35 = vrot.slane %v84_v33, 7 }
  0xcf   :  { %v89_v36 = vsel %vm88_vm2, %v87_v35, %v83_v34 }
  0xd0   :  { %92 = vst.msk [vmem:[#allocation7] sm:$0x3] %vm91_vm3, %v89_v36 }
  0xd1   :  { %169 = shalt.err (!%p166_p0)
}
  0xd2   :  { %102 = dma.vmem_to_hbm [thread:$0]  %s100_s1, 32, %s215_s2, [#allocation4]  }
  0xd3   :  { %182 = dma.done.wait [#allocation4], 32  }
  0xd4   :  { %183 = vsyncadd [#allocation4], 4294967264 }
  0xd5   :  { %106 = vsyncpa [#allocation3], 1 }
  0xd6   :  { %107 = vsyncpa [#allocation6], 1 }
  0xd7   :  { %108 = vsyncpa [#allocation4], 1 }

</bundles_post_ra>
